<compile_context>
chip_gen: v7x
topology: tpu7x:2x2x1
jax: 0.10.0
libtpu: 0.0.40
codegen_flags: <defaults>
</compile_context>

<pallas_src>
import functools
import numpy as np
import jax
import jax.numpy as jnp
from jax import lax
from jax.experimental import pallas as pl
from jax.experimental.pallas import tpu as pltpu


_ACTS = {
    'relu':      lambda x: jnp.maximum(x, 0.0),
    'elu':       lambda x: jnp.where(x > 0, x, jnp.expm1(x)),
    'sigmoid':   jax.nn.sigmoid,
    'tanh':      jnp.tanh,
    'gelu':      lambda x: jax.nn.gelu(x, approximate=False),  # torch nn.GELU (exact erf)
    'gelu_tanh': lambda x: jax.nn.gelu(x, approximate=True),   # EUP-friendly opt-in variant
    'lrelu':     lambda x: jnp.where(x > 0, x, 0.01 * x),
}
# TODO(synk): 'prelu' has a learnable slope parameter; not wired up here.
# TODO(synk): the episode's spec excerpt shows the `transformer` wrapper whose core
# get_transfromer_model(...) body is not included in the provided source; this file
# keeps (and improves per the review) the previously validated conv_3d fused forward.


def _round_up(x, m):
    return ((x + m - 1) // m) * m


def _cdiv(a, b):
    return (a + b - 1) // b


def _kernels_and_pools(shape, size):
    """Replicates conv_3d.__init__ kernel-size / pool-size selection."""
    kernels, pools = [], []
    for s in shape[-4:-1]:
        if s / 2 > size:
            kernels.append(size)
            pools.append(2 if s > 12 else 1)
        else:
            k = int(s / 2)
            kernels.append(k if k > 1 else 1)
            if s > 12:
                pools.append(2 if k > 1 else 1)
            else:
                pools.append(1)
    return kernels, pools


# ---- VMEM-driven tile selection (budget from v7x, the tightest generation) ----
_VMEM_BUDGET = 20 * 1024 * 1024      # stay well under the 32 MiB scoped limit
_VMEM_LIMIT = 32 * 1024 * 1024       # <= half of v7x's 64 MiB physical VMEM


def _choose_l2_tile(L2, P, K, Cout, n_batch, in_bytes):
    """Largest multiple-of-128 pooled-spatial tile whose double-buffered
    footprint fits the VMEM budget; for small L2 this is a single tile
    (grid becomes (N, 1)), for large L2 the tile is capped by VMEM."""
    l2_full = _round_up(L2, 128)
    per_col = (2 * in_bytes * P * K          # x block, double-buffered
               + 4 * P * Cout                # (Cout, P*TILE) f32 matmul result
               + 2 * 4 * Cout)               # f32 output block, double-buffered
    const = 2 * in_bytes * Cout * K + 4 * Cout   # weights (x2 bufs) + bias
    cap = max(128, ((_VMEM_BUDGET - const) // per_col) // 128 * 128)
    tile = min(l2_full, cap)
    # keep >= 2 parallel grid blocks so both v7x TensorCores get work
    if n_batch == 1 and tile >= l2_full and l2_full >= 256:
        tile = _round_up(_cdiv(l2_full, 2), 128)
    return tile


def _conv3d_fused_kernel(x_ref, w_ref, b_ref, o_ref, *, pool_window, tile, act):
    # x_ref: (1, K, P*TILE)   bf16  -- im2col patches for one pooled-spatial tile;
    #                                  the P pool offsets are P consecutive
    #                                  TILE-wide (lane-aligned) column groups
    # w_ref: (Cout, K)        bf16
    # b_ref: (Cout, 1)        f32
    # o_ref: (1, Cout, TILE)  f32   -- lane-dense output tile
    act_fn = _ACTS[act]
    # one wide MXU call per grid step (amortizes MXU push/drain/pop latency
    # vs P tiny matmuls; matters most on v5e/v6e's sequential result FIFO)
    y = jnp.dot(w_ref[...], x_ref[0], preferred_element_type=jnp.float32)
    y = act_fn(y + b_ref[...])                       # bias + activation BEFORE pooling
    acc = y[:, :tile]
    for p in range(1, pool_window):                  # P-1 lane-aligned VPU adds
        acc = acc + y[:, p * tile:(p + 1) * tile]
    o_ref[0] = (acc * (1.0 / pool_window)).astype(o_ref.dtype)   # AvgPool3d mean


def conv_3d_forward(x, weight, bias, kernels, pools, act='relu',
                    use_bf16_inputs=True, out_dtype=jnp.float32):
    """x: (B, C, H, W, T) float32 -> (B, Dp, Hp, Wp, Cout)."""
    kd, kh, kw = kernels
    pd, ph, pw = pools
    in_dtype = jnp.bfloat16 if use_bf16_inputs else jnp.float32
    # rearrange 'b c h w t -> b t c h w'  (NCDHW: T is the conv channel dim);
    # bf16 so the im2col expansion costs half the HBM bytes (MXU-input only,
    # all post-matmul math stays f32).
    x5 = jnp.transpose(x, (0, 4, 1, 2, 3)).astype(in_dtype)
    N, Cin, D, H, W = x5.shape
    Cout = weight.shape[0]
    Do, Ho, Wo = D - kd + 1, H - kh + 1, W - kw + 1
    Dp, Hp, Wp = Do // pd, Ho // ph, Wo // pw        # AvgPool3d floor semantics
    kk = kd * kh * kw
    K = Cin * kk
    P = pd * ph * pw
    L2 = Dp * Hp * Wp

    TILE = _choose_l2_tile(L2, P, K, Cout, N, jnp.dtype(in_dtype).itemsize)
    n_l2 = _cdiv(L2, TILE)
    L2p = n_l2 * TILE

    # ---- im2col, built directly in the kernel-facing (N, K, P, L2) order ----
    # patches[n, (cin,a,b,c), (pa,pb,pc), (d,h,w)] =
    #     x5[n, cin, d*pd + pa + a, h*ph + pb + b, w*pw + pc + c]
    cols = []
    for a in range(kd):
        for b in range(kh):
            for c in range(kw):
                for pa in range(pd):
                    for pb in range(ph):
                        for pc in range(pw):
                            cols.append(x5[:, :,
                                            a + pa: a + pa + pd * (Dp - 1) + 1: pd,
                                            b + pb: b + pb + ph * (Hp - 1) + 1: ph,
                                            c + pc: c + pc + pw * (Wp - 1) + 1: pw])
    patches = jnp.stack(cols, axis=2)                        # (N, Cin, kk*P, Dp, Hp, Wp)
    patches = patches.reshape(N, Cin, kk, P, Dp, Hp, Wp)
    patches = patches.reshape(N, K, P, L2)                   # K order == torch OIDHW flatten
    patches = jnp.pad(patches, ((0, 0), (0, 0), (0, 0), (0, L2p - L2)))
    # interleave so each L2 tile's P pool offsets are adjacent lane-column groups
    patches = patches.reshape(N, K, P, n_l2, TILE)
    patches = jnp.transpose(patches, (0, 1, 3, 2, 4))        # free bitcast when n_l2 == 1
    patches = patches.reshape(N, K, n_l2 * P * TILE)

    w2 = weight.reshape(Cout, K).astype(in_dtype)            # (Cout, K)
    b2 = bias.reshape(Cout, 1).astype(jnp.float32)           # (Cout, 1)

    kernel = functools.partial(_conv3d_fused_kernel,
                               pool_window=P, tile=TILE, act=act)
    out = pl.pallas_call(
        kernel,
        out_shape=jax.ShapeDtypeStruct((N, Cout, L2p), out_dtype),
        grid_spec=pltpu.PrefetchScalarGridSpec(
            num_scalar_prefetch=0,
            grid=(N, n_l2),
            in_specs=[
                pl.BlockSpec((1, K, P * TILE), lambda n, l: (n, 0, l)),
                pl.BlockSpec((Cout, K), lambda n, l: (0, 0)),
                pl.BlockSpec((Cout, 1), lambda n, l: (0, 0)),
            ],
            out_specs=pl.BlockSpec((1, Cout, TILE), lambda n, l: (n, 0, l)),
        ),
        compiler_params=pltpu.CompilerParams(
            dimension_semantics=("parallel", "parallel"),
            vmem_limit_bytes=_VMEM_LIMIT,
            # let XLA fuse the im2col pad/transpose producer into the input DMA
            allow_input_fusion=[True, False, False]),
    )(patches, w2, b2)

    # drop lane padding, unflatten spatial, rearrange channels-last
    out = out[:, :, :L2].reshape(N, Cout, Dp, Hp, Wp)
    return jnp.transpose(out, (0, 2, 3, 4, 1))               # (N, Dp, Hp, Wp, Cout)


if __name__ == "__main__":
    # Module config: params = {'filters': 4, 'act_func': 'relu', 'batch_norm': False},
    # size = 3, layer_id = 1, name_scope = 'data'  ->  Cout = 4 * (1 + 1) = 8
    B, C, H, W, T = 2, 8, 16, 16, 4
    shape = [B, C, H, W, T]
    size, layer_id, filters, act = 3, 1, 4, 'relu'
    kernels, pools = _kernels_and_pools(shape, size)   # -> [3,3,3], [1,2,2]
    Cin, Cout = T, filters * (layer_id + 1)

    key = jax.random.PRNGKey(0)
    kx, kw_, kb = jax.random.split(key, 3)
    x = jax.random.normal(kx, (B, C, H, W, T), jnp.float32)
    weight = 0.05 * jax.random.normal(kw_, (Cout, Cin, *kernels), jnp.float32)
    bias = 0.05 * jax.random.normal(kb, (Cout,), jnp.float32)
    # TODO(synk): BatchNorm3d branch (params['batch_norm']=True) not implemented;
    # this config uses bn=None exactly like the reference with batch_norm=False.

    fwd = jax.jit(functools.partial(conv_3d_forward,
                                    kernels=kernels, pools=pools, act=act))
    out = jax.block_until_ready(fwd(x, weight, bias))

    # Pure-JAX f32 reference: conv3d(valid) -> +bias -> relu -> avgpool -> rearrange
    x5 = jnp.transpose(x, (0, 4, 1, 2, 3))
    ref = lax.conv_general_dilated(
        x5, weight, (1, 1, 1), 'VALID',
        dimension_numbers=('NCDHW', 'OIDHW', 'NCDHW'),
        precision=lax.Precision.HIGHEST)
    ref = jnp.maximum(ref + bias[None, :, None, None, None], 0.0)
    pd, ph, pw = pools
    Nr, Co, Do, Ho, Wo = ref.shape
    Dp, Hp, Wp = Do // pd, Ho // ph, Wo // pw
    ref = ref[:, :, :Dp * pd, :Hp * ph, :Wp * pw]
    ref = ref.reshape(Nr, Co, Dp, pd, Hp, ph, Wp, pw).mean(axis=(3, 5, 7))
    ref = jnp.transpose(ref, (0, 2, 3, 4, 1))

    assert out.shape == ref.shape == (B, 6, 7, 7, Cout), (out.shape, ref.shape)
    np.testing.assert_allclose(np.asarray(out), np.asarray(ref), rtol=2e-2, atol=2e-2)
    print("KERNEL_OK")
</pallas_src>

<mosaic_0001>
module attributes {stable_mosaic.version = 11 : i64} {
  func.func @_conv3d_fused_kernel(%arg0: i32, %arg1: i32, %arg2: memref<1x108x1536xbf16, #tpu.memory_space<vmem>>, %arg3: memref<8x108xbf16, #tpu.memory_space<vmem>>, %arg4: memref<8x1xf32, #tpu.memory_space<vmem>>, %arg5: memref<1x8x384xf32, #tpu.memory_space<vmem>>) attributes {dimension_semantics = [#tpu.dimension_semantics<parallel>, #tpu.dimension_semantics<parallel>], iteration_bounds = array<i64: 2, 1>, scalar_prefetch = 0 : i64, scratch_operands = 0 : i64, tpu.core_type = #tpu.core_type<tc>, window_params = [{transform_indices = @transform_0, window_bounds = array<i64: 1, 108, 1536>}, {pipeline_mode = #tpu.pipeline_mode<synchronous>, transform_indices = @transform_1, window_bounds = array<i64: 8, 108>}, {pipeline_mode = #tpu.pipeline_mode<synchronous>, transform_indices = @transform_2, window_bounds = array<i64: 8, 1>}, {transform_indices = @transform_3, window_bounds = array<i64: 1, 8, 384>}]} {
    %c0 = arith.constant 0 : index
    %c0_0 = arith.constant 0 : index
    %0 = vector.load %arg3[%c0, %c0_0] : memref<8x108xbf16, #tpu.memory_space<vmem>>, vector<8x108xbf16>
    %c0_1 = arith.constant 0 : index
    %c0_2 = arith.constant 0 : index
    %c0_3 = arith.constant 0 : index
    %1 = vector.load %arg2[%c0_1, %c0_2, %c0_3] : memref<1x108x1536xbf16, #tpu.memory_space<vmem>>, vector<1x108x1536xbf16>
    %2 = vector.shape_cast %1 : vector<1x108x1536xbf16> to vector<108x1536xbf16>
    %cst = arith.constant dense<0.000000e+00> : vector<8x1536xf32>
    %3 = tpu.matmul %0, %2, %cst {dimension_numbers = #tpu.dot_dimension_numbers<[1], [0], [0], [1], [0, 0, 1, 1], [], []>} : vector<8x108xbf16>, vector<108x1536xbf16>, vector<8x1536xf32> -> vector<8x1536xf32>
    %c0_4 = arith.constant 0 : index
    %c0_5 = arith.constant 0 : index
    %4 = vector.load %arg4[%c0_4, %c0_5] : memref<8x1xf32, #tpu.memory_space<vmem>>, vector<8x1xf32>
    %5 = vector.broadcast %4 : vector<8x1xf32> to vector<8x1536xf32>
    %6 = arith.addf %3, %5 : vector<8x1536xf32>
    %cst_6 = arith.constant 0.000000e+00 : f32
    %7 = vector.broadcast %cst_6 : f32 to vector<8x1536xf32>
    %8 = arith.maximumf %6, %7 : vector<8x1536xf32>
    %9 = vector.extract_strided_slice %8 {offsets = [0, 0], sizes = [8, 384], strides = [1, 1]} : vector<8x1536xf32> to vector<8x384xf32>
    %10 = vector.extract_strided_slice %8 {offsets = [0, 384], sizes = [8, 384], strides = [1, 1]} : vector<8x1536xf32> to vector<8x384xf32>
    %11 = arith.addf %9, %10 : vector<8x384xf32>
    %12 = vector.extract_strided_slice %8 {offsets = [0, 768], sizes = [8, 384], strides = [1, 1]} : vector<8x1536xf32> to vector<8x384xf32>
    %13 = arith.addf %11, %12 : vector<8x384xf32>
    %14 = vector.extract_strided_slice %8 {offsets = [0, 1152], sizes = [8, 384], strides = [1, 1]} : vector<8x1536xf32> to vector<8x384xf32>
    %15 = arith.addf %13, %14 : vector<8x384xf32>
    %cst_7 = arith.constant 2.500000e-01 : f32
    %16 = vector.broadcast %cst_7 : f32 to vector<8x384xf32>
    %17 = arith.mulf %15, %16 : vector<8x384xf32>
    %c0_8 = arith.constant 0 : index
    %c0_9 = arith.constant 0 : index
    %c0_10 = arith.constant 0 : index
    %18 = vector.load %arg5[%c0_8, %c0_9, %c0_10] : memref<1x8x384xf32, #tpu.memory_space<vmem>>, vector<1x8x384xf32>
    %19 = vector.shape_cast %18 : vector<1x8x384xf32> to vector<8x384xf32>
    %20 = vector.shape_cast %17 : vector<8x384xf32> to vector<1x8x384xf32>
    tpu.vector_store %arg5[%c0_8, %c0_9, %c0_10], %20 {strides = array<i32>} : memref<1x8x384xf32, #tpu.memory_space<vmem>>, vector<1x8x384xf32>,
    return
  }
  func.func @transform_0(%arg0: i32, %arg1: i32) -> (i32, i32, i32) {
    %c0_i32 = arith.constant 0 : i32
    %c0_i32_0 = arith.constant 0 : i32
    return %arg0, %c0_i32, %arg1 : i32, i32, i32
  }
  func.func @transform_1(%arg0: i32, %arg1: i32) -> (i32, i32) {
    %c0_i32 = arith.constant 0 : i32
    %c0_i32_0 = arith.constant 0 : i32
    %c0_i32_1 = arith.constant 0 : i32
    return %c0_i32, %c0_i32_0 : i32, i32
  }
  func.func @transform_2(%arg0: i32, %arg1: i32) -> (i32, i32) {
    %c0_i32 = arith.constant 0 : i32
    %c0_i32_0 = arith.constant 0 : i32
    %c0_i32_1 = arith.constant 0 : i32
    return %c0_i32, %c0_i32_0 : i32, i32
  }
  func.func @transform_3(%arg0: i32, %arg1: i32) -> (i32, i32, i32) {
    %c0_i32 = arith.constant 0 : i32
    %c0_i32_0 = arith.constant 0 : i32
    return %arg0, %c0_i32, %arg1 : i32, i32, i32
  }
}

</mosaic_0001>

<bundles_post_ra>
// kernel: conv_3d_forward.1
= control target key start
LH: loop header
LB: loop body
LE: loop exit
PB: predicated region body
PF: predicated region fallthrough
CT: control target
= control target key end

     0   :  { %s1415_s12 = smov 0   ;;  %s1417_s13 = smov 0   ;;  %s1577_s0 = inlined_call_operand.vmem [shape: bf16[2,108,1536], index: 0, kind: input, shape index: {}]   ;;  %s1578_s1 = inlined_call_operand.vmem [shape: bf16[8,108], index: 1, kind: input, shape index: {}]   ;;  %s1579_s2 = inlined_call_operand.vmem [shape: f32[8,1], index: 2, kind: input, shape index: {}]   ;;  %s1580_s3 = inlined_call_operand.vmem [shape: f32[2,8,384], index: 3, kind: output, shape index: {}]  }
   0x1   :  { %s1419_s14 = smov 0  }
   0x2 LB: > { %s25_s15 = sadd.s32 1, %s1388_s13  ;;  %p1115_p0 = scmp.ge.s32.totalorder %s1392_s14, 1  ;;  %s1392_s14 = sphi %s1419_s14, %s13_s14   ;;  %s1388_s13 = sphi %s1417_s13, %s1582_s13   ;;  %s1384_s12 = sphi %s1415_s12, %s1581_s12  }
   0x3   : > { %p27_p1 = scmp.ge.s32.totalorder %s25_s15, 2  ;;  %p158_p2 = scmp.lt.s32.totalorder %s1392_s14, 3 }
   0x5   : > { %s1584_s15 = smov (%p27_p1, %s25_s15), 0  ;;  %p159_p3 = pnand %p1115_p0, %p158_p2 }
   0x6   : > { %p191_p4 = scmp.lt.s32.totalorder (!%p159_p3), %s1384_s12, 1  ;;  %v1394_v0 = vmov (!%p159_p3), 0   ;;  %v296_v1 = vld [vmem:[%s1579_s2] sm:$0xff] (!%p159_p3)  ;;  %vm714_vm0 = vcmask (!%p159_p3), 1045504   ;;  %vm710_vm1 = vcmask (!%p159_p3), 883712  }
   0x7   : > { %162 = sbr.rel (%p159_p3) target bundleno = 326 (0x146), region = 32  ;;  %783 = vmatprep.mubr.bf16.mxu0 (!%p159_p3), %v1394_v0  ;;  %824 = vmatprep.mubr.bf16.mxu1 (!%p159_p3), %v1394_v0  ;;  %v1484_v34 = vld [vmem:[%s1578_s1] sm:$0xf] (!%p159_p3) }
   0x8   : > { %1243 = vset.pattern.permute.xlu0 (!%p159_p3), %v1394_v0 }
   0x9   : > { %299 = vperm.xlu0 (!%p159_p3), %1243, %v296_v1  }
   0xe   : > { %s1586_s12 = smov (!%p191_p4, %s1384_s12), 1 }
   0xf   : > { %s1216_s18 = smul.u32 672, %s1586_s12 }
  0x10   : > { %s1217_s24 = smul.u32 24, %s1586_s12 }
  0x11   : > { %s1445_s21 = scalar_lea.vmem %s1577_s0, %s1216_s18 }
  0x12   : > { %v1244_v2 = vld [vmem:[%s1445_s21 + $0x4] ss:$48 sps:$4 sm:$0xff]   ;;  %v1246_v3 = vld [vmem:[%s1445_s21 + $0xc] ss:$48 sps:$4 sm:$0xff]   ;;  %v1248_v4 = vld [vmem:[%s1445_s21] ss:$48 sps:$4 sm:$0xff]   ;;  %s208_s27 = scalar_lea.vmem %s1580_s3, %s1217_s24 }
  0x13   : > { %751 = vmatprep.subr.bf16.mxu0 %v1244_v2  ;;  %v1249_v5 = vld [vmem:[%s1445_s21 + $0x8] ss:$48 sps:$4 sm:$0xff]   ;;  %792 = vmatprep.subr.bf16.mxu1 %v1246_v3  ;;  %v1250_v6 = vld [vmem:[%s1445_s21 + $0x64] ss:$48 sps:$4 sm:$0xff]   ;;  %v1252_v7 = vld [vmem:[%s1445_s21 + $0x6c] ss:$48 sps:$4 sm:$0xff]  }
  0x14   : > { %752 = vmatpush1.bf16.msra.mxu0 %v1248_v4  ;;  %793 = vmatpush1.bf16.msra.mxu1 %v1249_v5  ;;  %v1254_v8 = vld [vmem:[%s1445_s21 + $0x60] ss:$48 sps:$4 sm:$0xff]   ;;  %v1255_v9 = vld [vmem:[%s1445_s21 + $0x68] ss:$48 sps:$4 sm:$0xff]   ;;  %v1256_v10 = vld [vmem:[%s1445_s21 + $0xc4] ss:$48 sps:$4 sm:$0xff]  }
  0x15   : > { %753 = vmatprep.subr.bf16.mxu0 %v1250_v6  ;;  %794 = vmatprep.subr.bf16.mxu1 %v1252_v7  ;;  %v1258_v11 = vld [vmem:[%s1445_s21 + $0xcc] ss:$48 sps:$4 sm:$0xff]   ;;  %v1260_v12 = vld [vmem:[%s1445_s21 + $0xc0] ss:$48 sps:$4 sm:$0xff]   ;;  %v1261_v13 = vld [vmem:[%s1445_s21 + $0xc8] ss:$48 sps:$4 sm:$0xff]  }
  0x16   : > { %v1262_v14 = vld [vmem:[%s1445_s21 + $0x124] ss:$48 sps:$4 sm:$0xff]   ;;  %v1264_v15 = vld [vmem:[%s1445_s21 + $0x12c] ss:$48 sps:$4 sm:$0xff]   ;;  %v1266_v16 = vld [vmem:[%s1445_s21 + $0x120] ss:$48 sps:$4 sm:$0xff]  }
  0x17   : > { %v1267_v17 = vld [vmem:[%s1445_s21 + $0x128] ss:$48 sps:$4 sm:$0xff]   ;;  %v1268_v18 = vld [vmem:[%s1445_s21 + $0x184] ss:$48 sps:$4 sm:$0xff]   ;;  %v1270_v19 = vld [vmem:[%s1445_s21 + $0x18c] ss:$48 sps:$4 sm:$0xff]  }
  0x18   : > { %754 = vmatpush1.bf16.msra.mxu0 %v1254_v8  ;;  %795 = vmatpush1.bf16.msra.mxu1 %v1255_v9  ;;  %v1272_v20 = vld [vmem:[%s1445_s21 + $0x180] ss:$48 sps:$4 sm:$0xff]   ;;  %v1273_v21 = vld [vmem:[%s1445_s21 + $0x188] ss:$48 sps:$4 sm:$0xff]   ;;  %v1274_v22 = vld [vmem:[%s1445_s21 + $0x1e4] ss:$48 sps:$4 sm:$0xff]  }
  0x19   : > { %755 = vmatprep.subr.bf16.mxu0 %v1256_v10  ;;  %796 = vmatprep.subr.bf16.mxu1 %v1258_v11  ;;  %v1276_v23 = vld [vmem:[%s1445_s21 + $0x1ec] ss:$48 sps:$4 sm:$0xff]   ;;  %v1278_v24 = vld [vmem:[%s1445_s21 + $0x1e0] ss:$48 sps:$4 sm:$0xff]   ;;  %v1279_v25 = vld [vmem:[%s1445_s21 + $0x1e8] ss:$48 sps:$4 sm:$0xff]  }
  0x1a   : > { %v1280_v26 = vld [vmem:[%s1445_s21 + $0x244] ss:$48 sps:$4 sm:$0x3f]   ;;  %v1282_v27 = vld [vmem:[%s1445_s21 + $0x24c] ss:$48 sps:$4 sm:$0x3f]  }
  0x1b   : > { %v1284_v28 = vld [vmem:[%s1445_s21 + $0x240] ss:$48 sps:$4 sm:$0x3f]   ;;  %v1285_v29 = vld [vmem:[%s1445_s21 + $0x248] ss:$48 sps:$4 sm:$0x3f]  }
  0x1c   : > { %756 = vmatpush1.bf16.msra.mxu0 %v1260_v12  ;;  %797 = vmatpush1.bf16.msra.mxu1 %v1261_v13  ;;  %v716_v30 = vsel %vm714_vm0, %v1284_v28, 0  ;;  %v722_v31 = vsel %vm714_vm0, %v1285_v29, 0  ;;  %v1288_v32 = vld [vmem:[%s1445_s21 + $0x14] ss:$48 sps:$4 sm:$0xff]   ;;  %v1291_v33 = vld [vmem:[%s1445_s21 + $0x1c] ss:$48 sps:$4 sm:$0xff]  }
  0x1d   : > { %757 = vmatprep.subr.bf16.mxu0 %v1262_v14  ;;  %798 = vmatprep.subr.bf16.mxu1 %v1264_v15  ;;  %v1286_v35 = vld [vmem:[%s1445_s21 + $0x10] ss:$48 sps:$4 sm:$0xff]   ;;  %v1289_v36 = vld [vmem:[%s1445_s21 + $0x18] ss:$48 sps:$4 sm:$0xff]   ;;  %v1294_v37 = vld [vmem:[%s1445_s21 + $0x74] ss:$48 sps:$4 sm:$0xff]  }
  0x1e   : > { %v1297_v38 = vld [vmem:[%s1445_s21 + $0x7c] ss:$48 sps:$4 sm:$0xff]   ;;  %v1292_v39 = vld [vmem:[%s1445_s21 + $0x70] ss:$48 sps:$4 sm:$0xff]   ;;  %v1295_v40 = vld [vmem:[%s1445_s21 + $0x78] ss:$48 sps:$4 sm:$0xff]  }
  0x1f   : > { %v1300_v41 = vld [vmem:[%s1445_s21 + $0xd4] ss:$48 sps:$4 sm:$0xff]   ;;  %v1303_v42 = vld [vmem:[%s1445_s21 + $0xdc] ss:$48 sps:$4 sm:$0xff]   ;;  %v1298_v43 = vld [vmem:[%s1445_s21 + $0xd0] ss:$48 sps:$4 sm:$0xff]  }
  0x20   : > { %758 = vmatpush1.bf16.msra.mxu0 %v1266_v16  ;;  %799 = vmatpush1.bf16.msra.mxu1 %v1267_v17  ;;  %v1301_v44 = vld [vmem:[%s1445_s21 + $0xd8] ss:$48 sps:$4 sm:$0xff]   ;;  %v1306_v45 = vld [vmem:[%s1445_s21 + $0x134] ss:$48 sps:$4 sm:$0xff]   ;;  %v1309_v46 = vld [vmem:[%s1445_s21 + $0x13c] ss:$48 sps:$4 sm:$0xff]  }
  0x21   : > { %759 = vmatprep.subr.bf16.mxu0 %v1268_v18  ;;  %800 = vmatprep.subr.bf16.mxu1 %v1270_v19  ;;  %v1304_v47 = vld [vmem:[%s1445_s21 + $0x130] ss:$48 sps:$4 sm:$0xff]   ;;  %v1307_v48 = vld [vmem:[%s1445_s21 + $0x138] ss:$48 sps:$4 sm:$0xff]   ;;  %v1312_v49 = vld [vmem:[%s1445_s21 + $0x194] ss:$48 sps:$4 sm:$0xff]  }
  0x22   : > { %v1315_v50 = vld [vmem:[%s1445_s21 + $0x19c] ss:$48 sps:$4 sm:$0xff]   ;;  %v1310_v51 = vld [vmem:[%s1445_s21 + $0x190] ss:$48 sps:$4 sm:$0xff]   ;;  %v1313_v52 = vld [vmem:[%s1445_s21 + $0x198] ss:$48 sps:$4 sm:$0xff]  }
  0x23   : > { %v1318_v53 = vld [vmem:[%s1445_s21 + $0x1f4] ss:$48 sps:$4 sm:$0xff]   ;;  %v1321_v54 = vld [vmem:[%s1445_s21 + $0x1fc] ss:$48 sps:$4 sm:$0xff]   ;;  %v1316_v55 = vld [vmem:[%s1445_s21 + $0x1f0] ss:$48 sps:$4 sm:$0xff]  }
  0x24   : > { %760 = vmatpush1.bf16.msra.mxu0 %v1272_v20  ;;  %801 = vmatpush1.bf16.msra.mxu1 %v1273_v21  ;;  %v1322_v56 = vld [vmem:[%s1445_s21 + $0x254] ss:$48 sps:$4 sm:$0x3f]   ;;  %v1324_v57 = vld [vmem:[%s1445_s21 + $0x25c] ss:$48 sps:$4 sm:$0x3f]  }
  0x25   : > { %761 = vmatprep.subr.bf16.mxu0 %v1274_v22  ;;  %802 = vmatprep.subr.bf16.mxu1 %v1276_v23  ;;  %v1319_v58 = vld [vmem:[%s1445_s21 + $0x1f8] ss:$48 sps:$4 sm:$0xff]   ;;  %v1326_v59 = vld [vmem:[%s1445_s21 + $0x250] ss:$48 sps:$4 sm:$0x3f]  }
  0x26   : > { %v1327_v60 = vld [vmem:[%s1445_s21 + $0x258] ss:$48 sps:$4 sm:$0x3f]   ;;  %v728_v61 = vsel %vm714_vm0, %v1326_v59, 0  ;;  %v1330_v63 = vld [vmem:[%s1445_s21 + $0x24] ss:$48 sps:$4 sm:$0xff]  }
  0x27   : > { %v734_v62 = vsel %vm714_vm0, %v1327_v60, 0  ;;  %v1333_v1 = vld [vmem:[%s1445_s21 + $0x2c] ss:$48 sps:$4 sm:$0xff]   ;;  %v1328_v2 = vld [vmem:[%s1445_s21 + $0x20] ss:$48 sps:$4 sm:$0xff]  }
  0x28   : > { %762 = vmatpush1.bf16.msra.mxu0 %v1278_v24  ;;  %803 = vmatpush1.bf16.msra.mxu1 %v1279_v25  ;;  %v1331_v3 = vld [vmem:[%s1445_s21 + $0x28] ss:$48 sps:$4 sm:$0xff]   ;;  %v1336_v4 = vld [vmem:[%s1445_s21 + $0x84] ss:$48 sps:$4 sm:$0xff]   ;;  %v1339_v5 = vld [vmem:[%s1445_s21 + $0x8c] ss:$48 sps:$4 sm:$0xff]  }
  0x29   : > { %1202 = vmatprep.subr.msk.bf16.mxu0 %vm714_vm0, %v1280_v26  ;;  %1204 = vmatprep.subr.msk.bf16.mxu1 %vm714_vm0, %v1282_v27  ;;  %v1334_v6 = vld [vmem:[%s1445_s21 + $0x80] ss:$48 sps:$4 sm:$0xff]   ;;  %v1337_v7 = vld [vmem:[%s1445_s21 + $0x88] ss:$48 sps:$4 sm:$0xff]   ;;  %v1342_v8 = vld [vmem:[%s1445_s21 + $0xe4] ss:$48 sps:$4 sm:$0xff]  }
  0x2a   : > { %v1345_v9 = vld [vmem:[%s1445_s21 + $0xec] ss:$48 sps:$4 sm:$0xff]   ;;  %v1340_v10 = vld [vmem:[%s1445_s21 + $0xe0] ss:$48 sps:$4 sm:$0xff]   ;;  %v1343_v11 = vld [vmem:[%s1445_s21 + $0xe8] ss:$48 sps:$4 sm:$0xff]  }
  0x2b   : > { %v1348_v12 = vld [vmem:[%s1445_s21 + $0x144] ss:$48 sps:$4 sm:$0xff]   ;;  %v1351_v13 = vld [vmem:[%s1445_s21 + $0x14c] ss:$48 sps:$4 sm:$0xff]   ;;  %v1346_v14 = vld [vmem:[%s1445_s21 + $0x140] ss:$48 sps:$4 sm:$0xff]  }
  0x2c   : > { %764 = vmatpush1.bf16.msra.mxu0 %v716_v30  ;;  %805 = vmatpush1.bf16.msra.mxu1 %v722_v31  ;;  %v1349_v15 = vld [vmem:[%s1445_s21 + $0x148] ss:$48 sps:$4 sm:$0xff]   ;;  %v1357_v16 = vld [vmem:[%s1445_s21 + $0x1ac] ss:$48 sps:$4 sm:$0xff]   ;;  %v1352_v17 = vld [vmem:[%s1445_s21 + $0x1a0] ss:$48 sps:$4 sm:$0xff]  }
  0x2d   : > { %833 = vmatprep.subr.bf16.mxu0 %v1288_v32  ;;  %874 = vmatprep.subr.bf16.mxu1 %v1291_v33  ;;  %v1355_v18 = vld [vmem:[%s1445_s21 + $0x1a8] ss:$48 sps:$4 sm:$0xff]   ;;  %v1360_v19 = vld [vmem:[%s1445_s21 + $0x204] ss:$48 sps:$4 sm:$0xff]   ;;  %v1363_v20 = vld [vmem:[%s1445_s21 + $0x20c] ss:$48 sps:$4 sm:$0xff]  }
  0x2e   : > { %v1358_v21 = vld [vmem:[%s1445_s21 + $0x200] ss:$48 sps:$4 sm:$0xff]   ;;  %v1361_v22 = vld [vmem:[%s1445_s21 + $0x208] ss:$48 sps:$4 sm:$0xff]  }
  0x2f   : > { %1203 = vmatmul.mubr.msk.bf16.vlgmr.msra.gmra.mrb[0].mxu0 %vm710_vm1, %v1484_v34  ;;  %1205 = vmatmul.mubr.msk.bf16.vlgmr.msra.gmra.mrb[0].mxu1 %vm710_vm1, %v1484_v34  ;;  %v1364_v23 = vld [vmem:[%s1445_s21 + $0x264] ss:$48 sps:$4 sm:$0x3f]   ;;  %v1366_v24 = vld [vmem:[%s1445_s21 + $0x26c] ss:$48 sps:$4 sm:$0x3f]  }
  0x30   : > { %834 = vmatpush1.bf16.msra.mxu0 %v1286_v35  ;;  %875 = vmatpush1.bf16.msra.mxu1 %v1289_v36  ;;  %v1368_v25 = vld [vmem:[%s1445_s21 + $0x260] ss:$48 sps:$4 sm:$0x3f]   ;;  %v1369_v26 = vld [vmem:[%s1445_s21 + $0x268] ss:$48 sps:$4 sm:$0x3f]  }
  0x31   : > { %835 = vmatprep.subr.bf16.mxu0 %v1294_v37  ;;  %876 = vmatprep.subr.bf16.mxu1 %v1297_v38  ;;  %v740_v27 = vsel %vm714_vm0, %v1368_v25, 0  ;;  %v746_v28 = vsel %vm714_vm0, %v1369_v26, 0 }
  0x32   : > { %865 = vmatprep.mubr.bf16.mxu0 %v1394_v0  ;;  %906 = vmatprep.mubr.bf16.mxu1 %v1394_v0 }
  0x34   : > { %836 = vmatpush1.bf16.msra.mxu0 %v1292_v39  ;;  %877 = vmatpush1.bf16.msra.mxu1 %v1295_v40 }
  0x35   : > { %837 = vmatprep.subr.bf16.mxu0 %v1300_v41  ;;  %878 = vmatprep.subr.bf16.mxu1 %v1303_v42 }
  0x38   : > { %838 = vmatpush1.bf16.msra.mxu0 %v1298_v43  ;;  %879 = vmatpush1.bf16.msra.mxu1 %v1301_v44 }
  0x39   : > { %839 = vmatprep.subr.bf16.mxu0 %v1306_v45  ;;  %880 = vmatprep.subr.bf16.mxu1 %v1309_v46 }
  0x3c   : > { %840 = vmatpush1.bf16.msra.mxu0 %v1304_v47  ;;  %881 = vmatpush1.bf16.msra.mxu1 %v1307_v48 }
  0x3d   : > { %841 = vmatprep.subr.bf16.mxu0 %v1312_v49  ;;  %882 = vmatprep.subr.bf16.mxu1 %v1315_v50 }
  0x40   : > { %842 = vmatpush1.bf16.msra.mxu0 %v1310_v51  ;;  %883 = vmatpush1.bf16.msra.mxu1 %v1313_v52 }
  0x41   : > { %843 = vmatprep.subr.bf16.mxu0 %v1318_v53  ;;  %884 = vmatprep.subr.bf16.mxu1 %v1321_v54 }
  0x44   : > { %844 = vmatpush1.bf16.msra.mxu0 %v1316_v55  ;;  %885 = vmatpush1.bf16.msra.mxu1 %v1319_v58 }
  0x45   : > { %1206 = vmatprep.subr.msk.bf16.mxu0 %vm714_vm0, %v1322_v56  ;;  %1208 = vmatprep.subr.msk.bf16.mxu1 %vm714_vm0, %v1324_v57 }
  0x48   : > { %846 = vmatpush1.bf16.msra.mxu0 %v728_v61  ;;  %887 = vmatpush1.bf16.msra.mxu1 %v734_v62 }
  0x49   : > { %915 = vmatprep.subr.bf16.mxu0 %v1330_v63  ;;  %956 = vmatprep.subr.bf16.mxu1 %v1333_v1 }
  0x4b   : > { %1207 = vmatmul.mubr.msk.bf16.vlgmr.msra.gmra.mrb[4].mxu0 %vm710_vm1, %v1484_v34  ;;  %1209 = vmatmul.mubr.msk.bf16.vlgmr.msra.gmra.mrb[4].mxu1 %vm710_vm1, %v1484_v34 }
  0x4c   : > { %916 = vmatpush1.bf16.msra.mxu0 %v1328_v2  ;;  %957 = vmatpush1.bf16.msra.mxu1 %v1331_v3 }
  0x4d   : > { %917 = vmatprep.subr.bf16.mxu0 %v1336_v4  ;;  %958 = vmatprep.subr.bf16.mxu1 %v1339_v5 }
  0x4e   : > { %947 = vmatprep.mubr.bf16.mxu0 %v1394_v0  ;;  %988 = vmatprep.mubr.bf16.mxu1 %v1394_v0  ;;  %v1354_v0 = vld [vmem:[%s1445_s21 + $0x1a4] ss:$48 sps:$4 sm:$0xff]  }
  0x50   : > { %918 = vmatpush1.bf16.msra.mxu0 %v1334_v6  ;;  %959 = vmatpush1.bf16.msra.mxu1 %v1337_v7 }
  0x51   : > { %919 = vmatprep.subr.bf16.mxu0 %v1342_v8  ;;  %960 = vmatprep.subr.bf16.mxu1 %v1345_v9 }
  0x54   : > { %920 = vmatpush1.bf16.msra.mxu0 %v1340_v10  ;;  %961 = vmatpush1.bf16.msra.mxu1 %v1343_v11 }
  0x55   : > { %921 = vmatprep.subr.bf16.mxu0 %v1348_v12  ;;  %962 = vmatprep.subr.bf16.mxu1 %v1351_v13 }
  0x58   : > { %922 = vmatpush1.bf16.msra.mxu0 %v1346_v14  ;;  %963 = vmatpush1.bf16.msra.mxu1 %v1349_v15 }
  0x59   : > { %923 = vmatprep.subr.bf16.mxu0 %v1354_v0  ;;  %964 = vmatprep.subr.bf16.mxu1 %v1357_v16 }
  0x5c   : > { %924 = vmatpush1.bf16.msra.mxu0 %v1352_v17  ;;  %965 = vmatpush1.bf16.msra.mxu1 %v1355_v18 }
  0x5d   : > { %925 = vmatprep.subr.bf16.mxu0 %v1360_v19  ;;  %966 = vmatprep.subr.bf16.mxu1 %v1363_v20 }
  0x60   : > { %926 = vmatpush1.bf16.msra.mxu0 %v1358_v21  ;;  %967 = vmatpush1.bf16.msra.mxu1 %v1361_v22 }
  0x61   : > { %1210 = vmatprep.subr.msk.bf16.mxu0 %vm714_vm0, %v1364_v23  ;;  %1212 = vmatprep.subr.msk.bf16.mxu1 %vm714_vm0, %v1366_v24 }
  0x64   : > { %928 = vmatpush1.bf16.msra.mxu0 %v740_v27  ;;  %969 = vmatpush1.bf16.msra.mxu1 %v746_v28 }
  0x67   : > { %1211 = vmatmul.mubr.msk.bf16.vlgmr.msra.gmra.mrb[8].mxu0 %vm710_vm1, %v1484_v34  ;;  %1213 = vmatmul.mubr.msk.bf16.vlgmr.msra.gmra.mrb[8].mxu1 %vm710_vm1, %v1484_v34 }
  0x88   : > { %v300_v29 = vpop.permute.xlu0 %299 }
 0x102   : > { %v785_v30 = vpop.f32.mrb[0].mxu0  ;;  %v826_v31 = vpop.f32.mrb[0].mxu1 }
 0x103   : > { %v787_v32 = vpop.f32.mrb[1].mxu0  ;;  %v786_v33 = vadd.f32 %v785_v30, %v300_v29  ;;  %v828_v35 = vpop.f32.mrb[1].mxu1  ;;  %v827_v47 = vadd.f32 %v826_v31, %v300_v29 }
 0x104   : > { %v829_v36 = vadd.f32 %v828_v35, %v300_v29  ;;  %v789_v37 = vpop.f32.mrb[2].mxu0  ;;  %v830_v38 = vpop.f32.mrb[2].mxu1  ;;  %v788_v44 = vadd.f32 %v787_v32, %v300_v29 }
 0x105   : > { %v997_v39 = vmax.f32 %v786_v33, 0.0  ;;  %v790_v40 = vpop.f32.mrb[3].mxu0  ;;  %v831_v41 = vpop.f32.mrb[3].mxu1  ;;  %v999_v60 = vmax.f32 %v827_v47, 0.0 }
 0x106   : > { %v1000_v42 = vmax.f32 %v829_v36, 0.0  ;;  %v998_v55 = vmax.f32 %v788_v44, 0.0 }
 0x108   : > { %v1009_v43 = vadd.f32 %v1000_v42, %v997_v39 }
 0x11e   : > { %v867_v45 = vpop.f32.mrb[4].mxu0  ;;  %v908_v46 = vpop.f32.mrb[4].mxu1 }
 0x11f   : > { %v868_v48 = vadd.f32 %v867_v45, %v300_v29  ;;  %v909_v34 = vadd.f32 %v908_v46, %v300_v29  ;;  %v869_v49 = vpop.f32.mrb[5].mxu0  ;;  %v910_v50 = vpop.f32.mrb[5].mxu1 }
 0x120   : > { %v870_v51 = vadd.f32 %v869_v49, %v300_v29  ;;  %v911_v52 = vadd.f32 %v910_v50, %v300_v29  ;;  %v871_v53 = vpop.f32.mrb[6].mxu0  ;;  %v912_v54 = vpop.f32.mrb[6].mxu1 }
 0x121   : > { %v1001_v56 = vmax.f32 %v868_v48, 0.0  ;;  %v1003_v57 = vmax.f32 %v909_v34, 0.0  ;;  %v872_v58 = vpop.f32.mrb[7].mxu0  ;;  %v913_v59 = vpop.f32.mrb[7].mxu1 }
 0x122   : > { %v1002_v61 = vmax.f32 %v870_v51, 0.0  ;;  %v1004_v62 = vmax.f32 %v911_v52, 0.0 }
 0x123   : > { %v1010_v63 = vadd.f32 %v1001_v56, %v998_v55  ;;  %v1012_v1 = vadd.f32 %v1009_v43, %v1003_v57 }
 0x124   : > { %v1011_v2 = vadd.f32 %v1002_v61, %v999_v60 }
 0x125   : > { %v1013_v3 = vadd.f32 %v1010_v63, %v1004_v62 }
 0x13a   : > { %v949_v4 = vpop.f32.mrb[8].mxu0  ;;  %v990_v5 = vpop.f32.mrb[8].mxu1 }
 0x13b   : > { %v950_v6 = vadd.f32 %v949_v4, %v300_v29  ;;  %v991_v7 = vadd.f32 %v990_v5, %v300_v29  ;;  %v951_v8 = vpop.f32.mrb[9].mxu0  ;;  %v992_v9 = vpop.f32.mrb[9].mxu1 }
 0x13c   : > { %v952_v10 = vadd.f32 %v951_v8, %v300_v29  ;;  %v993_v11 = vadd.f32 %v992_v9, %v300_v29  ;;  %v953_v12 = vpop.f32.mrb[10].mxu0  ;;  %v994_v13 = vpop.f32.mrb[10].mxu1 }
 0x13d   : > { %v1005_v14 = vmax.f32 %v950_v6, 0.0  ;;  %v1007_v15 = vmax.f32 %v991_v7, 0.0  ;;  %v954_v0 = vpop.f32.mrb[11].mxu0  ;;  %v995_v16 = vpop.f32.mrb[11].mxu1 }
 0x13e   : > { %v1006_v17 = vmax.f32 %v952_v10, 0.0  ;;  %v1008_v18 = vmax.f32 %v993_v11, 0.0 }
 0x13f   : > { %v1014_v19 = vadd.f32 %v1011_v2, %v1005_v14  ;;  %v1016_v20 = vadd.f32 %v1013_v3, %v1007_v15 }
 0x140   : > { %v1015_v21 = vadd.f32 %v1012_v1, %v1006_v17 }
 0x141   : > { %v1019_v22 = vmul.f32 0.25, %v1016_v20  ;;  %v1017_v23 = vadd.f32 %v1014_v19, %v1008_v18 }
 0x142   : > { %v1018_v24 = vmul.f32 0.25, %v1015_v21 }
 0x143   : > { %1022 = vst [vmem:[%s208_s27 + $0x8] sm:$0xff] %v1019_v22  ;;  %v1020_v25 = vmul.f32 0.25, %v1017_v23 }
 0x144   : > { %1021 = vst [vmem:[%s208_s27] sm:$0xff] %v1018_v24 }
 0x145   : > { %1023 = vst [vmem:[%s208_s27 + $0x10] sm:$0xff] %v1020_v25 }
 0x146 PF: > { %s13_s14 = sadd.s32 1, %s1392_s14   ;;  %s1581_s12 = smov %s1388_s13 }
 0x147   : > { %p10_p5 = scmp.ge.s32.totalorder %s13_s14, 4   ;;  %s1582_s13 = smov %s1584_s15 }
 0x149   :  { %12 = sbr.rel (!%p10_p5) target bundleno = 2 (0x2), region = 62 }

</bundles_post_ra>
